<compile_context>
chip_gen: v5e
topology: v5e:2x2
jax: 0.10.0
libtpu: 0.0.40
codegen_flags: <defaults>
</compile_context>

<pallas_src>
import jax
import jax.numpy as jnp
from jax.experimental import pallas as pl
from jax.experimental.pallas import tpu as pltpu

LANE = 128      # lane width (last dim)
SUBLANE = 8     # sublane width (second-to-last dim)


def _round_up(x, m):
    return (x + m - 1) // m * m


def _make_fused_mlp_kernel(num_layers):
    """Build a kernel body for `num_layers` Linear+Tanh layers.

    Ref layout: (x_ref, w0, b0, w1, b1, ..., o_ref). All refs are whole
    VMEM-resident arrays; the layer loop is a static Python loop (unrolled
    at trace time), so the intermediate activation `h` lives in vregs/VMEM
    and never touches HBM.
    """
    def kernel(x_ref, *refs):
        o_ref = refs[-1]
        layer_refs = refs[:-1]
        h = x_ref[...]
        for i in range(num_layers):
            w = layer_refs[2 * i][...]        # (Din_pad, Dout_pad), f32
            b = layer_refs[2 * i + 1][...]    # (1, Dout_pad), broadcasts over batch
            y = jnp.dot(h, w, preferred_element_type=jnp.float32) + b  # MXU + VPU
            h = jnp.tanh(y)                                            # EUP
        o_ref[...] = h.astype(o_ref.dtype)

    return kernel


def mlp_forward(x, padded_params, out_dim):
    """Fused MLP forward: tanh(...tanh(x @ W0 + b0)... @ WL + bL).

    x:             (B, Din) float32
    padded_params: list of (w_t (Din_pad, Dout_pad), b (1, Dout_pad)) float32,
                   feature dims already padded to multiples of 128.
    out_dim:       true (unpadded) output feature dim.
    """
    B, Din = x.shape
    B_pad = _round_up(B, SUBLANE)
    Din_pad = padded_params[0][0].shape[0]
    Dlast_pad = padded_params[-1][0].shape[1]

    # Zero-pad the input activation to the lane/sublane grid.
    x_pad = jnp.zeros((B_pad, Din_pad), x.dtype).at[:B, :Din].set(x)

    flat_params = []
    for w_t, b in padded_params:
        flat_params.append(w_t)
        flat_params.append(b)

    num_layers = len(padded_params)
    n_inputs = 1 + 2 * num_layers

    out_pad = pl.pallas_call(
        _make_fused_mlp_kernel(num_layers),
        out_shape=jax.ShapeDtypeStruct((B_pad, Dlast_pad), x.dtype),
        # Everything is tiny: keep all operands whole in VMEM, no grid.
        in_specs=[pl.BlockSpec(memory_space=pltpu.MemorySpace.VMEM)] * n_inputs,
        out_specs=pl.BlockSpec(memory_space=pltpu.MemorySpace.VMEM),
    )(x_pad, *flat_params)

    # Strip batch / lane padding.
    return out_pad[:B, :out_dim]


def init_mlp_params(key, input_dim, hid_dims):
    """Xavier-normal weights, zero biases — matches nn.Linear (+xavier_normal_).

    PyTorch weight is (out, in); we store it transposed (in, out) so the kernel
    computes y = x @ W^T + b directly.
    """
    dims = [input_dim] + list(hid_dims)
    params = []
    for i in range(len(dims) - 1):
        fan_in, fan_out = dims[i], dims[i + 1]
        key, wk = jax.random.split(key)
        std = (2.0 / (fan_in + fan_out)) ** 0.5  # xavier_normal_
        w_t = (std * jax.random.normal(wk, (fan_in, fan_out))).astype(jnp.float32)
        b = jnp.zeros((fan_out,), dtype=jnp.float32)
        params.append((w_t, b))
    return params


def pad_params(params):
    """Zero-pad each (w_t, b) so every feature dim is a multiple of 128 lanes."""
    padded = []
    for w_t, b in params:
        din, dout = w_t.shape
        din_p = _round_up(din, LANE)
        dout_p = _round_up(dout, LANE)
        w_p = jnp.zeros((din_p, dout_p), jnp.float32).at[:din, :dout].set(w_t)
        b_p = jnp.zeros((1, dout_p), jnp.float32).at[0, :dout].set(b)
        padded.append((w_p, b_p))
    return padded


if __name__ == "__main__":
    key = jax.random.PRNGKey(0)

    batch = 8
    input_dim = 32
    hid_dims = [64, 32, 16]

    key, xk, pk = jax.random.split(key, 3)
    x = jax.random.normal(xk, (batch, input_dim), dtype=jnp.float32)
    params = init_mlp_params(pk, input_dim, hid_dims)
    padded_params = pad_params(params)

    out = mlp_forward(x, padded_params, out_dim=hid_dims[-1])
    out = jax.block_until_ready(out)

    # Sanity check against a plain-JAX (unpadded) reference forward pass.
    ref = x
    for w_t, b in params:
        ref = jnp.tanh(ref @ w_t + b[None, :])
    assert out.shape == (batch, hid_dims[-1])
    assert jnp.allclose(out, ref, atol=1e-5, rtol=1e-5)

    print("KERNEL_OK")
</pallas_src>

<mosaic_0001>
module attributes {stable_mosaic.version = 11 : i64} {
  func.func @kernel(%arg0: memref<8x128xf32, #tpu.memory_space<vmem>>, %arg1: memref<128x128xf32, #tpu.memory_space<vmem>>, %arg2: memref<1x128xf32, #tpu.memory_space<vmem>>, %arg3: memref<128x128xf32, #tpu.memory_space<vmem>>, %arg4: memref<1x128xf32, #tpu.memory_space<vmem>>, %arg5: memref<128x128xf32, #tpu.memory_space<vmem>>, %arg6: memref<1x128xf32, #tpu.memory_space<vmem>>, %arg7: memref<8x128xf32, #tpu.memory_space<vmem>>) attributes {dimension_semantics = [], scalar_prefetch = 0 : i64, scratch_operands = 0 : i64, tpu.core_type = #tpu.core_type<tc>} {
    %c0 = arith.constant 0 : index
    %c0_0 = arith.constant 0 : index
    %0 = vector.load %arg0[%c0, %c0_0] : memref<8x128xf32, #tpu.memory_space<vmem>>, vector<8x128xf32>
    %c0_1 = arith.constant 0 : index
    %c0_2 = arith.constant 0 : index
    %1 = vector.load %arg1[%c0_1, %c0_2] : memref<128x128xf32, #tpu.memory_space<vmem>>, vector<128x128xf32>
    %c0_3 = arith.constant 0 : index
    %c0_4 = arith.constant 0 : index
    %2 = vector.load %arg2[%c0_3, %c0_4] : memref<1x128xf32, #tpu.memory_space<vmem>>, vector<1x128xf32>
    %cst = arith.constant dense<0.000000e+00> : vector<8x128xf32>
    %3 = tpu.matmul %0, %1, %cst {dimension_numbers = #tpu.dot_dimension_numbers<[1], [0], [0], [1], [0, 0, 1, 1], [], []>} : vector<8x128xf32>, vector<128x128xf32>, vector<8x128xf32> -> vector<8x128xf32>
    %4 = vector.broadcast %2 : vector<1x128xf32> to vector<8x128xf32>
    %5 = arith.addf %3, %4 : vector<8x128xf32>
    %6 = math.tanh %5 : vector<8x128xf32>
    %c0_5 = arith.constant 0 : index
    %c0_6 = arith.constant 0 : index
    %7 = vector.load %arg3[%c0_5, %c0_6] : memref<128x128xf32, #tpu.memory_space<vmem>>, vector<128x128xf32>
    %c0_7 = arith.constant 0 : index
    %c0_8 = arith.constant 0 : index
    %8 = vector.load %arg4[%c0_7, %c0_8] : memref<1x128xf32, #tpu.memory_space<vmem>>, vector<1x128xf32>
    %cst_9 = arith.constant dense<0.000000e+00> : vector<8x128xf32>
    %9 = tpu.matmul %6, %7, %cst_9 {dimension_numbers = #tpu.dot_dimension_numbers<[1], [0], [0], [1], [0, 0, 1, 1], [], []>} : vector<8x128xf32>, vector<128x128xf32>, vector<8x128xf32> -> vector<8x128xf32>
    %10 = vector.broadcast %8 : vector<1x128xf32> to vector<8x128xf32>
    %11 = arith.addf %9, %10 : vector<8x128xf32>
    %12 = math.tanh %11 : vector<8x128xf32>
    %c0_10 = arith.constant 0 : index
    %c0_11 = arith.constant 0 : index
    %13 = vector.load %arg5[%c0_10, %c0_11] : memref<128x128xf32, #tpu.memory_space<vmem>>, vector<128x128xf32>
    %c0_12 = arith.constant 0 : index
    %c0_13 = arith.constant 0 : index
    %14 = vector.load %arg6[%c0_12, %c0_13] : memref<1x128xf32, #tpu.memory_space<vmem>>, vector<1x128xf32>
    %cst_14 = arith.constant dense<0.000000e+00> : vector<8x128xf32>
    %15 = tpu.matmul %12, %13, %cst_14 {dimension_numbers = #tpu.dot_dimension_numbers<[1], [0], [0], [1], [0, 0, 1, 1], [], []>} : vector<8x128xf32>, vector<128x128xf32>, vector<8x128xf32> -> vector<8x128xf32>
    %16 = vector.broadcast %14 : vector<1x128xf32> to vector<8x128xf32>
    %17 = arith.addf %15, %16 : vector<8x128xf32>
    %18 = math.tanh %17 : vector<8x128xf32>
    %c0_15 = arith.constant 0 : index
    %c0_16 = arith.constant 0 : index
    %19 = vector.load %arg7[%c0_15, %c0_16] : memref<8x128xf32, #tpu.memory_space<vmem>>, vector<8x128xf32>
    tpu.vector_store %arg7[%c0_15, %c0_16], %18 {strides = array<i32>} : memref<8x128xf32, #tpu.memory_space<vmem>>, vector<8x128xf32>,
    return
  }
}

</mosaic_0001>

<bundles_post_ra>
// kernel: tpu_custom_call.1
= control target key start
LH: loop header
LB: loop body
LE: loop exit
PB: predicated region body
PF: predicated region fallthrough
CT: control target
= control target key end

     0   :  { %12 = vsyncpa [#allocation3], 0  ;;  %s447_s0 = inlined_call_operand.hbm [shape: f32[8,128], index: 0, kind: input, shape index: {}]   ;;  %s448_s1 = inlined_call_operand.hbm [shape: f32[128,128], index: 1, kind: input, shape index: {}]   ;;  %s449_s2 = inlined_call_operand.vmem [shape: f32[1,128], index: 2, kind: input, shape index: {}]   ;;  %s450_s3 = inlined_call_operand.hbm [shape: f32[128,128], index: 3, kind: input, shape index: {}]   ;;  %s451_s4 = inlined_call_operand.vmem [shape: f32[1,128], index: 4, kind: input, shape index: {}]   ;;  %s452_s5 = inlined_call_operand.hbm [shape: f32[128,128], index: 5, kind: input, shape index: {}]   ;;  %s453_s6 = inlined_call_operand.vmem [shape: f32[1,128], index: 6, kind: input, shape index: {}]   ;;  %s454_s7 = inlined_call_operand.hbm [shape: f32[8,128], index: 7, kind: output, shape index: {}]  }
   0x1   :  { %13 = vsyncpa [#allocation6], 0 }
   0x2   :  { %14 = vsyncpa [#allocation9], 0  ;;  %s31_s26 = sshll.u32 %s448_s1, 4  ;;  %s32_s26 = int_to_ptr.hbm [resolvable:$true] %s31_s26 }
   0x3   :  { %15 = vsyncpa [#allocation4], 0  ;;  %s376_s27 = smov [#allocation5]   ;;  %s21_s8 = sshll.u32 %s447_s0, 4  ;;  %s22_s8 = int_to_ptr.hbm [resolvable:$true] %s21_s8 }
   0x4   :  { %s33_s28 = sshll.u32 %s376_s27, 4  ;;  %s377_s9 = smov 128   ;;  %s34_s28 = int_to_ptr.vmem [resolvable:$true] %s33_s28 }
   0x5   :  { %s378_s10 = smov 8   ;;  %s379_s11 = smov [#allocation2]  }
   0x6   :  { %39 = dma.hbm_to_vmem [thread:$0]  %s32_s26, 2048, %s34_s28, [#allocation6], %s377_s9, %s377_s9, %s378_s10  }
   0x7   :  { %s23_s12 = sshll.u32 %s379_s11, 4  ;;  %s46_s15 = sshll.u32 %s450_s3, 4  ;;  %s24_s12 = int_to_ptr.vmem [resolvable:$true] %s23_s12  ;;  %s47_s15 = int_to_ptr.hbm [resolvable:$true] %s46_s15 }
   0x8   :  { %26 = dma.hbm_to_vmem [thread:$0]  %s22_s8, 128, %s24_s12, [#allocation3]  }
   0x9   :  { %s61_s17 = sshll.u32 %s452_s5, 4  ;;  %s380_s18 = smov [#allocation7]   ;;  %s62_s17 = int_to_ptr.hbm [resolvable:$true] %s61_s17 }
   0xa   :  { %s48_s19 = sshll.u32 %s380_s18, 4  ;;  %s381_s0 = smov [#allocation8]   ;;  %s49_s19 = int_to_ptr.vmem [resolvable:$true] %s48_s19 }
   0xb   :  { %54 = dma.hbm_to_vmem [thread:$0]  %s47_s15, 2048, %s49_s19, [#allocation6], %s377_s9, %s377_s9, %s378_s10  }
   0xc   :  { %s63_s20 = sshll.u32 %s381_s0, 4  ;;  %s64_s20 = int_to_ptr.vmem [resolvable:$true] %s63_s20 }
   0xd   :  { %69 = dma.hbm_to_vmem [thread:$0]  %s62_s17, 2048, %s64_s20, [#allocation9], %s377_s9, %s377_s9, %s378_s10  }
   0xe   :  { %368 = dma.done.wait [#allocation3], 128  }
   0xf   :  { %369 = vsyncadd [#allocation3], 4294967168 }
  0x10   :  { %370 = dma.done.wait [#allocation6], 4096  }
  0x11   :  { %371 = vsyncadd [#allocation6], 4294963200 }
  0x12   :  { %372 = dma.done.wait [#allocation9], 2048  }
  0x13   :  { %373 = vsyncadd [#allocation9], 4294965248  ;;  %v104_v0 = vld [vmem:[#allocation5 + $0x78] sm:$0xff]  ;;  %v103_v1 = vld [vmem:[#allocation5 + $0x70] sm:$0xff]  ;;  %s382_s24 = smov [#allocation10]   ;;  %s220_s28 = sshll.u32 %s454_s7, 4  ;;  %s221_s28 = int_to_ptr.hbm [resolvable:$true] %s220_s28 }
  0x14   :  { %109 = vmatpush.msra.mxu0 %v104_v0  ;;  %v102_v2 = vld [vmem:[#allocation5 + $0x68] sm:$0xff]  ;;  %v101_v3 = vld [vmem:[#allocation5 + $0x60] sm:$0xff]  ;;  %v145_v4 = vld [vmem:[#allocation7 + $0x78] sm:$0xff]  ;;  %s218_s25 = sshll.u32 %s382_s24, 4  ;;  %s219_s25 = int_to_ptr.vmem [resolvable:$true] %s218_s25 }
  0x15   :  { %v100_v5 = vld [vmem:[#allocation5 + $0x58] sm:$0xff]  ;;  %150 = vmatpush.msra.mxu1 %v145_v4  ;;  %v144_v6 = vld [vmem:[#allocation7 + $0x70] sm:$0xff]  ;;  %v143_v7 = vld [vmem:[#allocation7 + $0x68] sm:$0xff] }
  0x16   :  { %110 = vmatpush.msra.mxu0 %v103_v1  ;;  %v99_v8 = vld [vmem:[#allocation5 + $0x50] sm:$0xff]  ;;  %v142_v9 = vld [vmem:[#allocation7 + $0x60] sm:$0xff]  ;;  %v98_v10 = vld [vmem:[#allocation5 + $0x48] sm:$0xff] }
  0x17   :  { %151 = vmatpush.msra.mxu1 %v144_v6  ;;  %v141_v11 = vld [vmem:[#allocation7 + $0x58] sm:$0xff]  ;;  %v97_v12 = vld [vmem:[#allocation5 + $0x40] sm:$0xff]  ;;  %v140_v13 = vld [vmem:[#allocation7 + $0x50] sm:$0xff] }
  0x18   :  { %111 = vmatpush.msra.mxu0 %v102_v2  ;;  %v96_v14 = vld [vmem:[#allocation5 + $0x38] sm:$0xff]  ;;  %v139_v15 = vld [vmem:[#allocation7 + $0x48] sm:$0xff]  ;;  %v95_v16 = vld [vmem:[#allocation5 + $0x30] sm:$0xff] }
  0x19   :  { %152 = vmatpush.msra.mxu1 %v143_v7  ;;  %v138_v17 = vld [vmem:[#allocation7 + $0x40] sm:$0xff]  ;;  %v94_v18 = vld [vmem:[#allocation5 + $0x28] sm:$0xff]  ;;  %v137_v19 = vld [vmem:[#allocation7 + $0x38] sm:$0xff] }
  0x1a   :  { %112 = vmatpush.msra.mxu0 %v101_v3  ;;  %v93_v20 = vld [vmem:[#allocation5 + $0x20] sm:$0xff]  ;;  %v136_v21 = vld [vmem:[#allocation7 + $0x30] sm:$0xff]  ;;  %v92_v22 = vld [vmem:[#allocation5 + $0x18] sm:$0xff] }
  0x1b   :  { %153 = vmatpush.msra.mxu1 %v142_v9  ;;  %v135_v23 = vld [vmem:[#allocation7 + $0x28] sm:$0xff]  ;;  %v91_v24 = vld [vmem:[#allocation5 + $0x10] sm:$0xff]  ;;  %v89_v26 = vld [vmem:[#allocation5] sm:$0xff] }
  0x1c   :  { %113 = vmatpush.msra.mxu0 %v100_v5  ;;  %v90_v25 = vld [vmem:[#allocation5 + $0x8] sm:$0xff]  ;;  %v88_v27 = vld [vmem:[#allocation2] sm:$0xff]  ;;  %v134_v28 = vld [vmem:[#allocation7 + $0x20] sm:$0xff] }
  0x1d   :  { %154 = vmatpush.msra.mxu1 %v141_v11  ;;  %v133_v29 = vld [vmem:[#allocation7 + $0x18] sm:$0xff]  ;;  %v132_v30 = vld [vmem:[#allocation7 + $0x10] sm:$0xff]  ;;  %v131_v31 = vld [vmem:[#allocation7 + $0x8] sm:$0xff] }
  0x1e   :  { %114 = vmatpush.msra.mxu0 %v99_v8  ;;  %v130_v32 = vld [vmem:[#allocation7] sm:$0xff]  ;;  %v186_v33 = vld [vmem:[#allocation8 + $0x78] sm:$0xff]  ;;  %v185_v34 = vld [vmem:[#allocation8 + $0x70] sm:$0xff] }
  0x1f   :  { %155 = vmatpush.msra.mxu1 %v140_v13  ;;  %191 = vmatpush.msra.mxu2 %v186_v33  ;;  %v184_v35 = vld [vmem:[#allocation8 + $0x68] sm:$0xff]  ;;  %v183_v36 = vld [vmem:[#allocation8 + $0x60] sm:$0xff]  ;;  %v182_v37 = vld [vmem:[#allocation8 + $0x58] sm:$0xff] }
  0x20   :  { %115 = vmatpush.msra.mxu0 %v98_v10  ;;  %v181_v38 = vld [vmem:[#allocation8 + $0x50] sm:$0xff]  ;;  %v180_v39 = vld [vmem:[#allocation8 + $0x48] sm:$0xff]  ;;  %v179_v40 = vld [vmem:[#allocation8 + $0x40] sm:$0xff] }
  0x21   :  { %156 = vmatpush.msra.mxu1 %v139_v15  ;;  %192 = vmatpush.msra.mxu2 %v185_v34  ;;  %v178_v41 = vld [vmem:[#allocation8 + $0x38] sm:$0xff]  ;;  %v177_v42 = vld [vmem:[#allocation8 + $0x30] sm:$0xff]  ;;  %v176_v43 = vld [vmem:[#allocation8 + $0x28] sm:$0xff] }
  0x22   :  { %116 = vmatpush.msra.mxu0 %v97_v12  ;;  %v239_v44 = vld [vmem:[%s449_s2] ss:$0 sm:$0xff]  ;;  %v175_v48 = vld [vmem:[#allocation8 + $0x20] sm:$0xff]  ;;  %v173_v50 = vld [vmem:[#allocation8 + $0x10] sm:$0xff] }
  0x23   :  { %157 = vmatpush.msra.mxu1 %v138_v17  ;;  %193 = vmatpush.msra.mxu2 %v184_v35  ;;  %v174_v49 = vld [vmem:[#allocation8 + $0x18] sm:$0xff]  ;;  %v172_v51 = vld [vmem:[#allocation8 + $0x8] sm:$0xff]  ;;  %v171_v52 = vld [vmem:[#allocation8] sm:$0xff] }
  0x24   :  { %117 = vmatpush.msra.mxu0 %v96_v14  ;;  %v240_v53 = vld [vmem:[%s451_s4] ss:$0 sm:$0xff] }
  0x25   :  { %158 = vmatpush.msra.mxu1 %v137_v19  ;;  %194 = vmatpush.msra.mxu2 %v183_v36  ;;  %v241_v57 = vld [vmem:[%s453_s6] ss:$0 sm:$0xff] }
  0x26   :  { %118 = vmatpush.msra.mxu0 %v95_v16 }
  0x27   :  { %159 = vmatpush.msra.mxu1 %v136_v21  ;;  %195 = vmatpush.msra.mxu2 %v182_v37 }
  0x28   :  { %119 = vmatpush.msra.mxu0 %v94_v18 }
  0x29   :  { %160 = vmatpush.msra.mxu1 %v135_v23  ;;  %196 = vmatpush.msra.mxu2 %v181_v38 }
  0x2a   :  { %120 = vmatpush.msra.mxu0 %v93_v20 }
  0x2b   :  { %161 = vmatpush.msra.mxu1 %v134_v28  ;;  %197 = vmatpush.msra.mxu2 %v180_v39 }
  0x2c   :  { %121 = vmatpush.msra.mxu0 %v92_v22 }
  0x2d   :  { %162 = vmatpush.msra.mxu1 %v133_v29  ;;  %198 = vmatpush.msra.mxu2 %v179_v40 }
  0x2e   :  { %122 = vmatpush.msra.mxu0 %v91_v24 }
  0x2f   :  { %163 = vmatpush.msra.mxu1 %v132_v30  ;;  %199 = vmatpush.msra.mxu2 %v178_v41 }
  0x30   :  { %123 = vmatpush.msra.mxu0 %v90_v25 }
  0x31   :  { %164 = vmatpush.msra.mxu1 %v131_v31  ;;  %200 = vmatpush.msra.mxu2 %v177_v42 }
  0x32   :  { %124 = vmatpush.msra.mxu0 %v89_v26 }
  0x33   :  { %125 = vmatmul.f32.vlgmr.msra.gmra.mxu0 %v88_v27  ;;  %165 = vmatpush.msra.mxu1 %v130_v32 }
  0x34   :  { %201 = vmatpush.msra.mxu2 %v176_v43 }
  0x36   :  { %202 = vmatpush.msra.mxu2 %v175_v48 }
  0x38   :  { %203 = vmatpush.msra.mxu2 %v174_v49 }
  0x3a   :  { %204 = vmatpush.msra.mxu2 %v173_v50 }
  0x3c   :  { %205 = vmatpush.msra.mxu2 %v172_v51 }
  0x3e   :  { %206 = vmatpush.msra.mxu2 %v171_v52 }
  0xb0   :  { %v126_v45 = vpop.f32.mrf.mxu0 }
  0xb1   :  { %v127_v46 = vadd.f32 %v239_v44, %v126_v45 }
  0xb3   :  { %242 = vtanh.f32 %v127_v46 }
  0xb9   :  { %v243_v47 = vpop.eup %242 }
  0xba   :  { %166 = vmatmul.f32.vlgmr.msra.gmra.mxu1 %v243_v47 }
 0x137   :  { %v167_v54 = vpop.f32.mrf.mxu1 }
 0x138   :  { %v168_v55 = vadd.f32 %v240_v53, %v167_v54 }
 0x13a   :  { %244 = vtanh.f32 %v168_v55 }
 0x140   :  { %v245_v56 = vpop.eup %244 }
 0x141   :  { %207 = vmatmul.f32.vlgmr.msra.gmra.mxu2 %v245_v56 }
 0x1c4   :  { %v208_v58 = vpop.f32.mrf.mxu2 }
 0x1c5   :  { %v209_v59 = vadd.f32 %v241_v57, %v208_v58 }
 0x1c7   :  { %246 = vtanh.f32 %v209_v59 }
 0x1cd   :  { %v247_v60 = vpop.eup %246 }
 0x1ce   :  { %212 = vst [vmem:[#allocation10] sm:$0xff] %v247_v60 }
 0x1cf   :  { %223 = dma.vmem_to_hbm [thread:$0]  %s219_s25, 128, %s221_s28, [#allocation4]  }
 0x1d0   :  { %374 = dma.done.wait [#allocation4], 128  }
 0x1d1   :  { %375 = vsyncadd [#allocation4], 4294967168 }
 0x1d2   :  { %228 = vsyncpa [#allocation3], 1 }
 0x1d3   :  { %229 = vsyncpa [#allocation6], 1 }
 0x1d4   :  { %230 = vsyncpa [#allocation9], 1 }
 0x1d5   :  { %231 = vsyncpa [#allocation4], 1 }

</bundles_post_ra>
